<compile_context>
chip_gen: v7x
topology: tpu7x:2x2x1
jax: 0.10.0
libtpu: 0.0.40
codegen_flags: <defaults>
</compile_context>

<pallas_src>
import functools
import math

import jax
import jax.numpy as jnp
import numpy as np
from jax import lax
from jax.experimental import pallas as pl
from jax.experimental.pallas import tpu as pltpu


# ----------------------------------------------------------------------------
# Chip-adaptive knobs
# ----------------------------------------------------------------------------
def _vmem_limit_bytes():
    """Scoped-VMEM limit: most of physical VMEM minus headroom for Mosaic scratch."""
    cap = 64 * 1024 * 1024  # conservative fallback (v7x per-TC size)
    try:
        info = pltpu.get_tpu_info()
        cap = int(getattr(info, "vmem_capacity_bytes", cap))
    except Exception:
        pass
    return max(32 * 1024 * 1024, min(cap - 16 * 1024 * 1024, 112 * 1024 * 1024))


def _default_tile_q():
    """256 fills the 256-wide MXU on v6e/v7x; 128 is native on v5e."""
    try:
        ver = str(getattr(pltpu.get_tpu_info(), "chip_version", "")).lower()
        if "5" in ver:
            return 128
    except Exception:
        pass
    return 256


# ----------------------------------------------------------------------------
# Tiled fused matmul + bias (fused QKV projection)
# ----------------------------------------------------------------------------
def _matmul_bias_kernel(x_ref, w_ref, b_ref, o_ref, acc_ref):
    @pl.when(pl.program_id(2) == 0)
    def _():
        acc_ref[...] = jnp.zeros_like(acc_ref)

    acc_ref[...] += jnp.dot(x_ref[...], w_ref[...],
                            preferred_element_type=jnp.float32)

    @pl.when(pl.program_id(2) == pl.num_programs(2) - 1)
    def _():
        o_ref[...] = (acc_ref[...] + b_ref[...].astype(jnp.float32)).astype(o_ref.dtype)


def _pick_tile(dim, pref, align):
    """Largest multiple of `align` that divides `dim` and is <= pref, else full dim."""
    if dim % align != 0:
        return dim
    t = min(pref, dim)
    t -= t % align
    while t > 0:
        if dim % t == 0:
            return t
        t -= align
    return dim


def pallas_matmul_bias(x, w, b, *, out_dtype=jnp.float32, tm=512, tn=512, tk=1024):
    M, K = x.shape
    K2, N = w.shape
    assert K2 == K
    tm = _pick_tile(M, tm, 8)
    tn = _pick_tile(N, tn, 128)
    tk = _pick_tile(K, tk, 128)
    grid = (M // tm, N // tn, K // tk)
    return pl.pallas_call(
        _matmul_bias_kernel,
        out_shape=jax.ShapeDtypeStruct((M, N), out_dtype),
        grid_spec=pltpu.PrefetchScalarGridSpec(
            num_scalar_prefetch=0,
            grid=grid,
            in_specs=[
                pl.BlockSpec((tm, tk), lambda i, j, k: (i, k)),
                pl.BlockSpec((tk, tn), lambda i, j, k: (k, j)),
                pl.BlockSpec((1, tn), lambda i, j, k: (0, j)),
            ],
            out_specs=pl.BlockSpec((tm, tn), lambda i, j, k: (i, j)),
            scratch_shapes=[pltpu.VMEM((tm, tn), jnp.float32)],
        ),
        compiler_params=pltpu.CompilerParams(
            dimension_semantics=("parallel", "parallel", "arbitrary"),
            vmem_limit_bytes=_vmem_limit_bytes()),
    )(x, w, b.reshape(1, N).astype(jnp.float32))


# ----------------------------------------------------------------------------
# Head-contracted matmul + bias (output projection from (H, M, Dh) layout)
# ----------------------------------------------------------------------------
def _head_matmul_bias_kernel(x_ref, w_ref, b_ref, o_ref, acc_ref):
    @pl.when(pl.program_id(2) == 0)
    def _():
        acc_ref[...] = jnp.zeros_like(acc_ref)

    acc_ref[...] += jnp.dot(x_ref[0], w_ref[0],
                            preferred_element_type=jnp.float32)

    @pl.when(pl.program_id(2) == pl.num_programs(2) - 1)
    def _():
        o_ref[...] = (acc_ref[...] + b_ref[...].astype(jnp.float32)).astype(o_ref.dtype)


def pallas_head_matmul_bias(x, w, b, *, out_dtype=jnp.float32, tm=512, tn=512):
    """out[m, :] = sum_h x[h, m, :] @ w[h] + b  — consumes the attention kernel's
    (H, B*S, Dh) output layout directly (no head transpose of activations)."""
    H, M, Dh = x.shape
    H2, Dh2, N = w.shape
    assert H2 == H and Dh2 == Dh
    tm = _pick_tile(M, tm, 8)
    tn = _pick_tile(N, tn, 128)
    grid = (M // tm, N // tn, H)
    return pl.pallas_call(
        _head_matmul_bias_kernel,
        out_shape=jax.ShapeDtypeStruct((M, N), out_dtype),
        grid_spec=pltpu.PrefetchScalarGridSpec(
            num_scalar_prefetch=0,
            grid=grid,
            in_specs=[
                pl.BlockSpec((1, tm, Dh), lambda i, j, h: (h, i, 0)),
                pl.BlockSpec((1, Dh, tn), lambda i, j, h: (h, 0, j)),
                pl.BlockSpec((1, tn), lambda i, j, h: (0, j)),
            ],
            out_specs=pl.BlockSpec((tm, tn), lambda i, j, h: (i, j)),
            scratch_shapes=[pltpu.VMEM((tm, tn), jnp.float32)],
        ),
        compiler_params=pltpu.CompilerParams(
            dimension_semantics=("parallel", "parallel", "arbitrary"),
            vmem_limit_bytes=_vmem_limit_bytes()),
    )(x, w, b.reshape(1, N).astype(jnp.float32))


# ----------------------------------------------------------------------------
# MoBA attention kernel (one (batch, head, q-tile) per invocation)
# ----------------------------------------------------------------------------
def _moba_attn_kernel(needed_ref, q_ref, k_ref, v_ref, topk_ref, o_ref, acc_ref, *,
                      num_heads, block_size, kv_chunk, seq_len, top_k,
                      compute_dtype, n_chunks, n_words, num_qt, approx_recip):
    bs = block_size
    KVC = kv_chunk
    TQ = q_ref.shape[2]
    n_sub = KVC // bs
    f32 = jnp.float32

    b = pl.program_id(0)
    h = pl.program_id(1)
    t = pl.program_id(2)
    row_start = t * TQ

    # Small iota planes only — never an S x S index/score plane.
    row_ids = row_start + lax.broadcasted_iota(jnp.int32, (TQ, 1), 0)      # (TQ, 1)
    row_block = row_ids // bs
    col_off = lax.broadcasted_iota(jnp.int32, (1, KVC), 1)                 # (1, KVC)
    sub_off = lax.broadcasted_iota(jnp.int32, (1, n_sub), 1)               # (1, n_sub)

    q_h = q_ref[0, 0]        # (TQ, Dh); 1/sqrt(Dh) already folded into the projection
    topk_h = topk_ref[0, 0]  # (TQ, top_k) int32

    acc_ref[...] = jnp.zeros_like(acc_ref)

    word_base = ((b * num_heads + h) * num_qt + t) * n_words

    @pl.loop(0, n_chunks)
    def _(c):
        word = needed_ref[word_base + c // 32]

        @pl.when(((word >> (c % 32)) & 1) != 0)      # skip KV chunks nobody selected
        def _():
            start = pl.multiple_of(c * KVC, KVC)
            k_c = k_ref[0, 0, pl.ds(start, KVC), :]                        # (KVC, Dh)
            v_c = v_ref[0, 0, pl.ds(start, KVC), :]                        # (KVC, Dh)

            # QK^T as a trans-B contraction (no explicit transpose), f32 accumulate.
            s = lax.dot_general(q_h, k_c,
                                dimension_numbers=(((1,), (1,)), ((), ())),
                                preferred_element_type=f32)                # (TQ, KVC)

            col_ids = start + col_off                                      # (1, KVC)
            causal_ok = (col_ids <= row_ids) & (col_ids < seq_len)         # (TQ, KVC)

            # Block-granular gating: (TQ, n_sub) compares instead of (TQ, KVC).
            blk_ids = c * n_sub + sub_off                                  # (1, n_sub)
            sel = topk_h[:, 0:1] == blk_ids
            for tt in range(1, top_k):
                sel = sel | (topk_h[:, tt:tt + 1] == blk_ids)
            moba_ok = sel & (blk_ids < row_block)                          # (TQ, n_sub)
            is_self = blk_ids == row_block                                 # (TQ, n_sub)

            # Per-MoBA-block softmax; normalized probabilities are assembled into one
            # (TQ, KVC) tile so PV is a single full-width MXU dot per chunk.
            p_parts = []
            for sb in range(n_sub):
                c0, c1 = sb * bs, (sb + 1) * bs
                m_sb = jnp.where(is_self[:, sb:sb + 1], causal_ok[:, c0:c1],
                                 moba_ok[:, sb:sb + 1])                    # (TQ, bs)
                s_sb = jnp.where(m_sb, s[:, c0:c1], jnp.float32(-1e30))
                mx = jnp.max(s_sb, axis=-1, keepdims=True)
                p_sb = jnp.where(m_sb, jnp.exp(s_sb - mx), 0.0)
                den = jnp.sum(p_sb, axis=-1, keepdims=True)
                # den > 0 guard keeps fully-masked blocks (and padded rows) at zero.
                inv = pl.reciprocal(jnp.where(den > 0.0, den, 1.0),
                                    approx=approx_recip)
                p_parts.append(p_sb * inv)

            p = p_parts[0] if n_sub == 1 else jnp.concatenate(p_parts, axis=-1)
            acc_ref[...] += jnp.dot(p.astype(compute_dtype), v_c,
                                    preferred_element_type=f32)

    o_ref[0, 0] = acc_ref[...].astype(o_ref.dtype)


# ----------------------------------------------------------------------------
# Full forward (glue + kernels)
# ----------------------------------------------------------------------------
def _round_up(x, m):
    return ((x + m - 1) // m) * m


def moba_attention(x, params, *, num_heads, block_size, top_k,
                   compute_dtype=jnp.float32, tile_q=None, kv_chunk=None):
    B, S, D = x.shape
    H = num_heads
    assert D % H == 0
    Dh = D // H
    f32 = jnp.float32
    cd = compute_dtype
    scale = 1.0 / math.sqrt(Dh)

    # ---- fused QKV projection; 1/sqrt(Dh) folded into wq/bq (top-k ordering is
    #      invariant under a positive scale, so gating is unchanged) ----
    w_qkv = jnp.concatenate(
        [params["wq"] * scale, params["wk"], params["wv"]], axis=1).astype(cd)
    b_qkv = jnp.concatenate(
        [params["bq"] * scale, params["bk"], params["bv"]]).astype(f32)
    x2d = x.reshape(B * S, D).astype(cd)
    qkv = pallas_matmul_bias(x2d, w_qkv, b_qkv, out_dtype=cd)              # (B*S, 3D)

    qkv = qkv.reshape(B, S, 3, H, Dh)
    q = qkv[:, :, 0].transpose(0, 2, 1, 3)   # (B, H, S, Dh), pre-scaled
    k = qkv[:, :, 1].transpose(0, 2, 1, 3)
    v = qkv[:, :, 2].transpose(0, 2, 1, 3)

    # ---- MoBA gating (glue): block-mean keys, causal block mask, top-k ----
    # TODO(synk): top-k selection stays in plain JAX (no clean in-kernel top-k on TPU).
    num_blocks = -(-S // block_size)
    eff_k = min(top_k, num_blocks)
    pad_kv0 = num_blocks * block_size - S
    k_gate = jnp.pad(k, ((0, 0), (0, 0), (0, pad_kv0), (0, 0))) if pad_kv0 else k
    k_mean = k_gate.astype(f32).reshape(B, H, num_blocks, block_size, Dh).mean(axis=3)
    gate = jnp.einsum("bhsd,bhnd->bhsn", q.astype(f32), k_mean)
    qb = jnp.arange(S, dtype=jnp.int32) // block_size
    future = qb[:, None] < jnp.arange(num_blocks, dtype=jnp.int32)[None, :]
    gate = jnp.where(future[None, None], -jnp.inf, gate)
    _, topk_idx = lax.top_k(gate, eff_k)
    topk_idx = topk_idx.astype(jnp.int32)                                  # (B,H,S,eff_k)

    # ---- tiling parameters ----
    if tile_q is None:
        tile_q = min(_default_tile_q(), _round_up(S, 8))
    TQ = tile_q
    assert TQ % 8 == 0, "tile_q must be a multiple of 8"
    num_qt = -(-S // TQ)
    Sq = num_qt * TQ

    lcm_bs8 = block_size * 8 // math.gcd(block_size, 8)
    if kv_chunk is None:
        kv_chunk = lcm_bs8 * max(1, 512 // lcm_bs8)
        kv_chunk = min(kv_chunk, _round_up(num_blocks * block_size, lcm_bs8))
    KVC = kv_chunk
    assert KVC % block_size == 0 and KVC % 8 == 0
    n_chunks = -(-(num_blocks * block_size) // KVC)
    Skv = n_chunks * KVC
    bpc = KVC // block_size

    def pad_seq(t_, new_s):
        cur = t_.shape[2]
        if new_s > cur:
            return jnp.pad(t_, ((0, 0), (0, 0), (0, new_s - cur), (0, 0)))
        return t_

    qp = pad_seq(q, Sq)
    kp = pad_seq(k, Skv)
    vp = pad_seq(v, Skv)
    topk_p = pad_seq(topk_idx, Sq)

    # ---- per-(b, h, q-tile, chunk) "needed" bitmap, bit-packed for SMEM ----
    blocks = jnp.arange(num_blocks, dtype=jnp.int32)
    row_blk = jnp.arange(S, dtype=jnp.int32) // block_size
    sel_any = (topk_idx[..., None] == blocks).any(axis=-2)                 # (B,H,S,NB)
    moba_needed = sel_any & (blocks[None, :] < row_blk[:, None])[None, None]
    self_needed = (blocks[None, :] == row_blk[:, None])[None, None]
    row_needed = moba_needed | self_needed                                 # (B,H,S,NB)
    row_needed = jnp.pad(
        row_needed, ((0, 0), (0, 0), (0, Sq - S), (0, n_chunks * bpc - num_blocks)))
    chunk_needed = row_needed.reshape(B, H, num_qt, TQ, n_chunks, bpc).any(axis=(3, 5))
    n_words = -(-n_chunks // 32)
    cn = jnp.pad(chunk_needed, ((0, 0), (0, 0), (0, 0), (0, n_words * 32 - n_chunks)))
    cn = cn.reshape(B, H, num_qt, n_words, 32).astype(jnp.int32)
    bit_vals = jnp.left_shift(jnp.int32(1), jnp.arange(32, dtype=jnp.int32))
    needed_bits = jnp.sum(cn * bit_vals, axis=-1, dtype=jnp.int32).reshape(-1)

    # ---- attention kernel ----
    kernel = functools.partial(
        _moba_attn_kernel,
        num_heads=H, block_size=block_size, kv_chunk=KVC, seq_len=S, top_k=eff_k,
        compute_dtype=cd, n_chunks=n_chunks, n_words=n_words, num_qt=num_qt,
        approx_recip=(cd != jnp.float32))

    attn = pl.pallas_call(
        kernel,
        out_shape=jax.ShapeDtypeStruct((H, B, Sq, Dh), cd),
        grid_spec=pltpu.PrefetchScalarGridSpec(
            num_scalar_prefetch=1,
            grid=(B, H, num_qt),
            in_specs=[
                pl.BlockSpec((1, 1, TQ, Dh), lambda b, h, t, nd: (b, h, t, 0)),
                # One head's K/V only; the index_map ignores the innermost q-tile axis,
                # so K/V stay resident in VMEM across all q-tiles of a (batch, head).
                pl.BlockSpec((1, 1, Skv, Dh), lambda b, h, t, nd: (b, h, 0, 0)),
                pl.BlockSpec((1, 1, Skv, Dh), lambda b, h, t, nd: (b, h, 0, 0)),
                pl.BlockSpec((1, 1, TQ, eff_k), lambda b, h, t, nd: (b, h, t, 0)),
            ],
            out_specs=pl.BlockSpec((1, 1, TQ, Dh), lambda b, h, t, nd: (h, b, t, 0)),
            scratch_shapes=[pltpu.VMEM((TQ, Dh), jnp.float32)],
        ),
        compiler_params=pltpu.CompilerParams(
            # b/h are the parallel (megacore-splittable) axes -> disjoint K/V per core.
            dimension_semantics=("parallel", "parallel", "arbitrary"),
            vmem_limit_bytes=_vmem_limit_bytes()),
    )(needed_bits, qp, kp, vp, topk_p)

    # ---- output projection: contract over heads straight from (H, B, Sq, Dh) ----
    attn2 = attn[:, :, :S, :].reshape(H, B * S, Dh).astype(cd)
    wo_h = params["wo"].reshape(H, Dh, D).astype(cd)
    out = pallas_head_matmul_bias(attn2, wo_h, params["bo"].astype(f32), out_dtype=f32)
    return out.reshape(B, S, D)


# ----------------------------------------------------------------------------
# Pure-numpy reference (mirrors the PyTorch module semantics)
# ----------------------------------------------------------------------------
def reference_forward(x, params, num_heads, block_size, top_k):
    x = np.asarray(x, np.float32)
    B, S, D = x.shape
    Dh = D // num_heads

    def lin(a, w, b):
        return a @ np.asarray(w, np.float32) + np.asarray(b, np.float32)

    x2 = x.reshape(B * S, D)
    q = lin(x2, params["wq"], params["bq"]).reshape(B, S, num_heads, Dh).transpose(0, 2, 1, 3)
    k = lin(x2, params["wk"], params["bk"]).reshape(B, S, num_heads, Dh).transpose(0, 2, 1, 3)
    v = lin(x2, params["wv"], params["bv"]).reshape(B, S, num_heads, Dh).transpose(0, 2, 1, 3)

    num_blocks = math.ceil(S / block_size)
    pad = num_blocks * block_size - S
    k_pad = np.pad(k, ((0, 0), (0, 0), (0, pad), (0, 0)))
    k_mean = k_pad.reshape(B, num_heads, num_blocks, block_size, Dh).mean(3)
    scores = np.einsum("bhsd,bhnd->bhsn", q, k_mean)
    qb = np.arange(S) // block_size
    scores = np.where((qb[:, None] < np.arange(num_blocks)[None, :])[None, None],
                      -np.inf, scores)
    eff_k = min(top_k, num_blocks)
    topk = np.argsort(-scores, axis=-1)[..., :eff_k]

    scale = 1.0 / math.sqrt(Dh)

    def attn(qv, kk, vv):
        s = (kk @ qv) * scale
        s = s - s.max()
        p = np.exp(s)
        p = p / p.sum()
        return p @ vv

    out = np.zeros_like(q)
    for b in range(B):
        for h in range(num_heads):
            for i in range(S):
                cb = i // block_size
                bs0 = cb * block_size
                be = min(bs0 + block_size, S)
                ke = min(i + 1, be)
                out[b, h, i] = attn(q[b, h, i], k[b, h, bs0:ke], v[b, h, bs0:ke])
                for bi in topk[b, h, i]:
                    if bi >= cb:
                        continue
                    s0 = bi * block_size
                    e0 = min(s0 + block_size, S)
                    out[b, h, i] += attn(q[b, h, i], k[b, h, s0:e0], v[b, h, s0:e0])

    out = out.transpose(0, 2, 1, 3).reshape(B * S, D)
    out = lin(out, params["wo"], params["bo"]).reshape(B, S, D)
    return out


if __name__ == "__main__":
    B, S, D = 2, 16, 32
    num_heads, block_size, top_k = 4, 4, 2

    key = jax.random.PRNGKey(0)
    ks = jax.random.split(key, 9)
    bound = 1.0 / math.sqrt(D)

    def u(kk, shape):
        return jax.random.uniform(kk, shape, jnp.float32, -bound, bound)

    params = {
        "wq": u(ks[0], (D, D)), "bq": u(ks[1], (D,)),
        "wk": u(ks[2], (D, D)), "bk": u(ks[3], (D,)),
        "wv": u(ks[4], (D, D)), "bv": u(ks[5], (D,)),
        "wo": u(ks[6], (D, D)), "bo": u(ks[7], (D,)),
    }
    x = jax.random.normal(ks[8], (B, S, D), jnp.float32)

    # f32 MXU path: strict check against the numpy reference.  tile_q=8 / kv_chunk=8
    # exercise multi-tile queries, multi-chunk KV loops, bitmap chunk skipping and
    # multi-sub-block softmax + fused PV.
    out = moba_attention(x, params, num_heads=num_heads, block_size=block_size,
                         top_k=top_k, compute_dtype=jnp.float32,
                         tile_q=8, kv_chunk=8)
    out = jax.block_until_ready(out)
    ref = reference_forward(x, params, num_heads, block_size, top_k)
    np.testing.assert_allclose(np.asarray(out), ref, rtol=2e-2, atol=2e-2)

    # bf16 MXU path (v6e/v7x production configuration) with default chip-adaptive
    # tiling.  bf16 gating may pick different near-tie blocks than the f32 reference,
    # so only sanity-check the run here.
    out_bf = moba_attention(x, params, num_heads=num_heads, block_size=block_size,
                            top_k=top_k, compute_dtype=jnp.bfloat16)
    out_bf = jax.block_until_ready(out_bf)
    assert out_bf.shape == (B, S, D) and bool(jnp.isfinite(out_bf).all())

    print("KERNEL_OK")
</pallas_src>

<mosaic_0001>
module attributes {stable_mosaic.version = 11 : i64} {
  func.func @_matmul_bias_kernel(%arg0: i32, %arg1: i32, %arg2: i32, %arg3: memref<32x32xf32, #tpu.memory_space<vmem>>, %arg4: memref<32x96xf32, #tpu.memory_space<vmem>>, %arg5: memref<1x96xf32, #tpu.memory_space<vmem>>, %arg6: memref<32x96xf32, #tpu.memory_space<vmem>>, %arg7: memref<32x96xf32, #tpu.memory_space<vmem>>) attributes {dimension_semantics = [#tpu.dimension_semantics<parallel>, #tpu.dimension_semantics<parallel>, #tpu.dimension_semantics<arbitrary>], iteration_bounds = array<i64: 1, 1, 1>, scalar_prefetch = 0 : i64, scratch_operands = 1 : i64, tpu.core_type = #tpu.core_type<tc>, window_params = [{transform_indices = @transform_0, window_bounds = array<i64: 32, 32>}, {transform_indices = @transform_1, window_bounds = array<i64: 32, 96>}, {transform_indices = @transform_2, window_bounds = array<i64: 1, 96>}, {transform_indices = @transform_3, window_bounds = array<i64: 32, 96>}]} {
    %c0_i32 = arith.constant 0 : i32
    %0 = arith.cmpi eq, %arg2, %c0_i32 : i32
    %1 = arith.extui %0 : i1 to i32
    %c0_i32_0 = arith.constant 0 : i32
    %2 = arith.cmpi ne, %1, %c0_i32_0 : i32
    scf.if %2 {
      %cst_10 = arith.constant 0.000000e+00 : f32
      %12 = vector.broadcast %cst_10 : f32 to vector<32x96xf32>
      %c0_11 = arith.constant 0 : index
      %c0_12 = arith.constant 0 : index
      %13 = vector.load %arg7[%c0_11, %c0_12] : memref<32x96xf32, #tpu.memory_space<vmem>>, vector<32x96xf32>
      tpu.vector_store %arg7[%c0_11, %c0_12], %12 {strides = array<i32>} : memref<32x96xf32, #tpu.memory_space<vmem>>, vector<32x96xf32>,
    } else {
    }
    %c0 = arith.constant 0 : index
    %c0_1 = arith.constant 0 : index
    %3 = vector.load %arg7[%c0, %c0_1] : memref<32x96xf32, #tpu.memory_space<vmem>>, vector<32x96xf32>
    %c0_2 = arith.constant 0 : index
    %c0_3 = arith.constant 0 : index
    %4 = vector.load %arg3[%c0_2, %c0_3] : memref<32x32xf32, #tpu.memory_space<vmem>>, vector<32x32xf32>
    %c0_4 = arith.constant 0 : index
    %c0_5 = arith.constant 0 : index
    %5 = vector.load %arg4[%c0_4, %c0_5] : memref<32x96xf32, #tpu.memory_space<vmem>>, vector<32x96xf32>
    %cst = arith.constant dense<0.000000e+00> : vector<32x96xf32>
    %6 = tpu.matmul %4, %5, %cst {dimension_numbers = #tpu.dot_dimension_numbers<[1], [0], [0], [1], [0, 0, 1, 1], [], []>} : vector<32x32xf32>, vector<32x96xf32>, vector<32x96xf32> -> vector<32x96xf32>
    %7 = arith.addf %3, %6 : vector<32x96xf32>
    %c0_6 = arith.constant 0 : index
    %c0_7 = arith.constant 0 : index
    %8 = vector.load %arg7[%c0_6, %c0_7] : memref<32x96xf32, #tpu.memory_space<vmem>>, vector<32x96xf32>
    tpu.vector_store %arg7[%c0_6, %c0_7], %7 {strides = array<i32>} : memref<32x96xf32, #tpu.memory_space<vmem>>, vector<32x96xf32>,
    %c0_i32_8 = arith.constant 0 : i32
    %9 = arith.cmpi eq, %arg2, %c0_i32_8 : i32
    %10 = arith.extui %9 : i1 to i32
    %c0_i32_9 = arith.constant 0 : i32
    %11 = arith.cmpi ne, %10, %c0_i32_9 : i32
    scf.if %11 {
      %c0_10 = arith.constant 0 : index
      %c0_11 = arith.constant 0 : index
      %12 = vector.load %arg7[%c0_10, %c0_11] : memref<32x96xf32, #tpu.memory_space<vmem>>, vector<32x96xf32>
      %c0_12 = arith.constant 0 : index
      %c0_13 = arith.constant 0 : index
      %13 = vector.load %arg5[%c0_12, %c0_13] : memref<1x96xf32, #tpu.memory_space<vmem>>, vector<1x96xf32>
      %14 = vector.broadcast %13 : vector<1x96xf32> to vector<32x96xf32>
      %15 = arith.addf %12, %14 : vector<32x96xf32>
      %c0_14 = arith.constant 0 : index
      %c0_15 = arith.constant 0 : index
      %16 = vector.load %arg6[%c0_14, %c0_15] : memref<32x96xf32, #tpu.memory_space<vmem>>, vector<32x96xf32>
      tpu.vector_store %arg6[%c0_14, %c0_15], %15 {strides = array<i32>} : memref<32x96xf32, #tpu.memory_space<vmem>>, vector<32x96xf32>,
    } else {
    }
    return
  }
  func.func @transform_0(%arg0: i32, %arg1: i32, %arg2: i32) -> (i32, i32) {
    %c0_i32 = arith.constant 0 : i32
    return %arg0, %arg2 : i32, i32
  }
  func.func @transform_1(%arg0: i32, %arg1: i32, %arg2: i32) -> (i32, i32) {
    %c0_i32 = arith.constant 0 : i32
    return %arg2, %arg1 : i32, i32
  }
  func.func @transform_2(%arg0: i32, %arg1: i32, %arg2: i32) -> (i32, i32) {
    %c0_i32 = arith.constant 0 : i32
    %c0_i32_0 = arith.constant 0 : i32
    return %c0_i32, %arg1 : i32, i32
  }
  func.func @transform_3(%arg0: i32, %arg1: i32, %arg2: i32) -> (i32, i32) {
    %c0_i32 = arith.constant 0 : i32
    return %arg0, %arg1 : i32, i32
  }
}

</mosaic_0001>

<bundles_post_ra>
// kernel: tpu_custom_call.1
= control target key start
LH: loop header
LB: loop body
LE: loop exit
PB: predicated region body
PF: predicated region fallthrough
CT: control target
= control target key end

     0   :  { %8 = vsyncpa [#allocation4], 0  ;;  %s418_s0 = inlined_call_operand.hbm [shape: f32[32,32], index: 0, kind: input, shape index: {}]   ;;  %s419_s1 = inlined_call_operand.hbm [shape: f32[32,96], index: 1, kind: input, shape index: {}]   ;;  %s420_s2 = inlined_call_operand.vmem [shape: f32[1,96], index: 2, kind: input, shape index: {}]   ;;  %s421_s3 = inlined_call_operand.hbm [shape: f32[32,96], index: 3, kind: output, shape index: {}]  }
   0x1   :  { %9 = vsyncpa [#allocation7], 0 }
   0x2   :  { %10 = vsyncpa [#allocation5], 0  ;;  %s328_s12 = smov [#allocation3]   ;;  %s256_s16 = scalar_lea.hbm %s418_s0, 512 }
   0x3   :  { %s16_s13 = sshll.u32 %s328_s12, 4  ;;  %p257_p0 = scmp.ne.s32.totalorder %s418_s0, %s256_s16  ;;  %s17_s13 = int_to_ptr.vmem [resolvable:$true] %s16_s13 }
   0x4   :  { %p260_p1 = scmp.lt.u32.totalorder %s256_s16, %s418_s0 }
   0x6   :  { %p262_p2 = pnand %p260_p1, %p257_p0 }
   0x8   :  { %265 = shalt.err (!%p262_p2)
}
   0x9   :  { %s266_s21 = scalar_lea.vmem %s17_s13, 512  ;;  %p271_p4 = scmp.lt.s32.totalorder %s17_s13, %s17_s13 }
   0xa   :  { %p267_p3 = scmp.ne.s32.totalorder %s17_s13, %s266_s21  ;;  %p272_p5 = scmp.lt.s32.totalorder %s266_s21, %s266_s21 }
   0xc   :  { %p273_p6 = por %p272_p5, %p271_p4 }
   0xe   :  { %p274_p7 = pnand %p273_p6, %p267_p3 }
  0x10   :  { %277 = shalt.err (!%p274_p7)
}
  0x11   :  { %s329_s22 = smov 128   ;;  %s330_s23 = smov 8  }
  0x12   :  { %22 = dma.hbm_to_vmem [thread:$0]  %s418_s0, 512, %s17_s13, [#allocation4], %s329_s22, %s329_s22, %s330_s23  }
  0x13   :  { %s331_s26 = smov [#allocation6]   ;;  %s278_s30 = scalar_lea.hbm %s419_s1, 512 }
  0x14   :  { %s28_s27 = sshll.u32 %s331_s26, 4  ;;  %p279_p8 = scmp.ne.s32.totalorder %s419_s1, %s278_s30  ;;  %s29_s27 = int_to_ptr.vmem [resolvable:$true] %s28_s27 }
  0x15   :  { %p282_p9 = scmp.lt.u32.totalorder %s278_s30, %s419_s1 }
  0x17   :  { %p284_p10 = pnand %p282_p9, %p279_p8 }
  0x19   :  { %287 = shalt.err (!%p284_p10)
}
  0x1a   :  { %s288_s8 = scalar_lea.vmem %s29_s27, 512  ;;  %p293_p12 = scmp.lt.s32.totalorder %s29_s27, %s29_s27 }
  0x1b   :  { %p289_p11 = scmp.ne.s32.totalorder %s29_s27, %s288_s8  ;;  %p294_p13 = scmp.lt.s32.totalorder %s288_s8, %s288_s8 }
  0x1d   :  { %p295_p0 = por %p294_p13, %p293_p12 }
  0x1f   :  { %p296_p1 = pnand %p295_p0, %p289_p11 }
  0x21   :  { %299 = shalt.err (!%p296_p1)
}
  0x22   :  { %34 = dma.hbm_to_vmem [thread:$0]  %s419_s1, 512, %s29_s27, [#allocation7], %s329_s22, %s329_s22, %s330_s23  }
  0x23   :  { %322 = dma.done.wait [#allocation4], 512  }
  0x24   :  { %323 = vsyncadd [#allocation4], 4294966784 }
  0x25   :  { %324 = dma.done.wait [#allocation7], 512  }
  0x26   :  { %325 = vsyncadd [#allocation7], 4294966784  ;;  %vm47_vm0 = vcmask 785408   ;;  %v332_v0 = vmov 0.0   ;;  %vm64_vm1 = vcmask 261120   ;;  %v60_v1 = vld [vmem:[#allocation6] sm:$0xff] }
  0x27   :  { %49 = vst.msk [vmem:[#allocation2 + $0x8] sm:$0xff] %vm47_vm0, %v332_v0  ;;  %48 = vst.msk [vmem:[#allocation2] sm:$0xff] %vm47_vm0, %v332_v0  ;;  %v61_v2 = vld [vmem:[#allocation6 + $0x8] sm:$0xff]  ;;  %v62_v3 = vld [vmem:[#allocation6 + $0x10] sm:$0xff]  ;;  %s333_s11 = smov [#allocation8]  }
  0x28   :  { %50 = vst.msk [vmem:[#allocation2 + $0x10] sm:$0xff] %vm47_vm0, %v332_v0  ;;  %51 = vst.msk [vmem:[#allocation2 + $0x18] sm:$0xff] %vm47_vm0, %v332_v0  ;;  %v238_v4 = vpack.c.bf16 %v61_v2, %v60_v1  ;;  %v63_v5 = vld [vmem:[#allocation6 + $0x18] sm:$0xff]  ;;  %v56_v6 = vld [vmem:[#allocation3] sm:$0xff]  ;;  %s198_s12 = sshll.u32 %s333_s11, 4  ;;  %s199_s12 = int_to_ptr.vmem [resolvable:$true] %s198_s12 }
  0x29   :  { %v58_v7 = vld [vmem:[#allocation3 + $0x10] sm:$0xff]  ;;  %v242_v8 = vpack.c.bf16 %v63_v5, %v62_v3  ;;  %232 = vmatprep.mubr.msk.f32.mxu0 %vm64_vm1, %v56_v6  ;;  %v57_v9 = vld [vmem:[#allocation3 + $0x8] sm:$0xff]  ;;  %v59_v10 = vld [vmem:[#allocation3 + $0x18] sm:$0xff]  ;;  %p305_p3 = scmp.lt.s32.totalorder %s199_s12, %s199_s12 }
  0x2a   :  { %235 = vmatprep.mubr.msk.f32.mxu1 %vm64_vm1, %v58_v7  ;;  %239 = vmatprep.subr.bf16.mxu0 %v238_v4  ;;  %v215_v23 = vld [vmem:[%s420_s2] ss:$0 sm:$0xff]  ;;  %s300_s2 = scalar_lea.vmem %s199_s12, 512 }
  0x2b   :  { %246 = vmatprep.subr.bf16.mxu1 %v238_v4  ;;  %241 = vmatpush3.bf16.msra.mxu0 %v238_v4  ;;  %p301_p2 = scmp.ne.s32.totalorder %s199_s12, %s300_s2  ;;  %p306_p4 = scmp.lt.s32.totalorder %s300_s2, %s300_s2 }
  0x2c   :  { %248 = vmatpush3.bf16.msra.mxu1 %v238_v4  ;;  %243 = vmatprep.subr.bf16.mxu0 %v242_v8 }
  0x2d   :  { %247 = vmatprep.subr.bf16.mxu1 %v242_v8  ;;  %p307_p5 = por %p306_p4, %p305_p3 }
  0x2e   :  { %v53_v11 = vld [vmem:[#allocation2 + $0x8] sm:$0xff]  ;;  %v52_v13 = vld [vmem:[#allocation2] sm:$0xff] }
  0x2f   :  { %245 = vmatpush3.bf16.msra.mxu0 %v242_v8  ;;  %v55_v12 = vld [vmem:[#allocation2 + $0x18] sm:$0xff]  ;;  %v54_v14 = vld [vmem:[#allocation2 + $0x10] sm:$0xff]  ;;  %p308_p6 = pnand %p307_p5, %p301_p2 }
  0x30   :  { %249 = vmatpush3.bf16.msra.mxu1 %v242_v8 }
  0x32   :  { %233 = vmatmul.mubr.msk.f32.vlgmr.msra.gmra.mrb[0].mxu0 %vm64_vm1, %v57_v9 }
  0x33   :  { %236 = vmatmul.mubr.msk.f32.vlgmr.msra.gmra.mrb[0].mxu1 %vm64_vm1, %v59_v10 }
 0x105   :  { %v234_v15 = vpop.f32.mrb[0].mxu0 }
 0x106   :  { %v237_v16 = vpop.f32.mrb[0].mxu1  ;;  %v163_v17 = vadd.f32 %v234_v15, %v53_v11  ;;  %v143_v19 = vpop.f32.mrb[1].mxu0 }
 0x107   :  { %v165_v18 = vadd.f32 %v237_v16, %v55_v12  ;;  %v153_v20 = vpop.f32.mrb[1].mxu1  ;;  %v162_v21 = vadd.f32 %v143_v19, %v52_v13 }
 0x108   :  { %v164_v22 = vadd.f32 %v153_v20, %v54_v14  ;;  %168 = vst.msk [vmem:[#allocation2 + $0x8] sm:$0xff] %vm47_vm0, %v163_v17 }
 0x109   :  { %170 = vst.msk [vmem:[#allocation2 + $0x18] sm:$0xff] %vm47_vm0, %v165_v18  ;;  %167 = vst.msk [vmem:[#allocation2] sm:$0xff] %vm47_vm0, %v162_v21 }
 0x10a   :  { %169 = vst.msk [vmem:[#allocation2 + $0x10] sm:$0xff] %vm47_vm0, %v164_v22 }
 0x10f   :  { %v175_v24 = vld [vmem:[#allocation2 + $0x8] sm:$0xff] }
 0x110   :  { %v177_v25 = vld [vmem:[#allocation2 + $0x18] sm:$0xff]  ;;  %v174_v26 = vld [vmem:[#allocation2] sm:$0xff]  ;;  %v186_v28 = vadd.f32 %v215_v23, %v175_v24 }
 0x111   :  { %v176_v27 = vld [vmem:[#allocation2 + $0x10] sm:$0xff]  ;;  %v188_v29 = vadd.f32 %v215_v23, %v177_v25  ;;  %v185_v30 = vadd.f32 %v215_v23, %v174_v26 }
 0x112   :  { %v187_v31 = vadd.f32 %v215_v23, %v176_v27  ;;  %190 = vst.msk [vmem:[#allocation8 + $0x8] sm:$0xff] %vm47_vm0, %v186_v28 }
 0x113   :  { %192 = vst.msk [vmem:[#allocation8 + $0x18] sm:$0xff] %vm47_vm0, %v188_v29  ;;  %189 = vst.msk [vmem:[#allocation8] sm:$0xff] %vm47_vm0, %v185_v30 }
 0x114   :  { %191 = vst.msk [vmem:[#allocation8 + $0x10] sm:$0xff] %vm47_vm0, %v187_v31 }
 0x115   :  { %311 = shalt.err (!%p308_p6)
}
 0x116   :  { %s312_s15 = scalar_lea.hbm %s421_s3, 512 }
 0x117   :  { %p313_p7 = scmp.ne.s32.totalorder %s421_s3, %s312_s15  ;;  %p316_p8 = scmp.lt.u32.totalorder %s312_s15, %s421_s3 }
 0x119   :  { %p318_p9 = pnand %p316_p8, %p313_p7 }
 0x11b   :  { %321 = shalt.err (!%p318_p9)
}
 0x11c   :  { %204 = dma.vmem_to_hbm [thread:$0]  %s199_s12, 512, %s421_s3, [#allocation5], %s329_s22, %s329_s22, %s330_s23  }
 0x11d   :  { %326 = dma.done.wait [#allocation5], 512  }
 0x11e   :  { %327 = vsyncadd [#allocation5], 4294966784 }
 0x11f   :  { %208 = vsyncpa [#allocation4], 1 }
 0x120   :  { %209 = vsyncpa [#allocation7], 1 }
 0x121   :  { %210 = vsyncpa [#allocation5], 1 }

</bundles_post_ra>
